<compile_context>
chip_gen: v6e
topology: v6e:2x2x1
jax: 0.10.0
libtpu: 0.0.40
codegen_flags: <defaults>
</compile_context>

<pallas_src>
import functools

import jax
import jax.numpy as jnp
from jax.experimental import pallas as pl
from jax.experimental.pallas import tpu as pltpu

_LANES = 128
_SUBLANES = 8
_GRAIN = _SUBLANES * _LANES          # 1024: kernel-prefix element granularity
_STRIP = 256                         # rows per inner accumulation strip


def _rmse_partial_kernel(yhat_ref, y_ref, out_ref, acc_ref, *,
                         tile_rows: int, strip_rows: int, valid_rows: int,
                         nblocks: int, steps: int,
                         needs_skip: bool, has_partial_last: bool):
    """Accumulate sum((yhat - y)^2) for one chunk of row-tiles.

    grid = (chunks, steps); axis 0 is parallel (one chunk per TensorCore on
    v7x), axis 1 is the sequential reduction.  One f32 partial sum per chunk.
    """
    i = pl.program_id(0)          # chunk index (parallel)
    j = pl.program_id(1)          # step within chunk (reduction)
    blk = i * steps + j           # linear block index into the slab

    @pl.when(j == 0)
    def _init():
        acc_ref[...] = jnp.zeros_like(acc_ref)

    def accum_strip(row0, rows, mask_rows):
        # Cast on the VPU so bf16/fp8 inputs don't inflate HBM traffic.
        a = yhat_ref[pl.ds(row0, rows), :].astype(jnp.float32)
        b = y_ref[pl.ds(row0, rows), :].astype(jnp.float32)
        d = a - b
        if mask_rows:
            # Rows past `valid_rows` are partial-block padding with
            # unspecified contents: zero them before squaring.
            row_ids = (blk * tile_rows + row0
                       + jax.lax.broadcasted_iota(jnp.int32, (rows, 1), 0))
            d = jnp.where(row_ids < valid_rows, d, 0.0)
        # Fold into an (8,128) vector accumulator with VPU adds only; the
        # cross-lane reduce happens once in the finalize branch.
        acc_ref[...] += (d * d).reshape(rows // _SUBLANES, _SUBLANES,
                                        _LANES).sum(axis=0)

    def accum_block(mask_rows):
        n_strips = tile_rows // strip_rows
        rem = tile_rows - n_strips * strip_rows      # static, multiple of 8
        if n_strips > 0:
            def body(s, carry):
                accum_strip(pl.multiple_of(s * strip_rows, strip_rows),
                            strip_rows, mask_rows)
                return carry
            jax.lax.fori_loop(0, n_strips, body, 0)
        if rem:
            accum_strip(n_strips * strip_rows, rem, mask_rows)

    if has_partial_last:
        # Only the genuinely partial last block pays for the iota/select mask;
        # duplicate over-coverage blocks (blk >= nblocks) skip compute.
        @pl.when(blk < nblocks - 1)
        def _full_blocks():
            accum_block(mask_rows=False)

        @pl.when(blk == nblocks - 1)
        def _partial_block():
            accum_block(mask_rows=True)
    elif needs_skip:
        @pl.when(blk < nblocks)
        def _full_blocks():
            accum_block(mask_rows=False)
    else:
        accum_block(mask_rows=False)

    @pl.when(j == steps - 1)
    def _finalize():
        out_ref[0, 0] = jnp.sum(acc_ref[...])


def _tpu_generation() -> str:
    try:
        kind = jax.devices()[0].device_kind.lower()
    except Exception:
        return ""
    for tag in ("v7", "v6", "v5"):
        if tag in kind:
            return tag
    return ""


def _default_tiling(itemsize: int):
    """Dtype- and generation-aware (tile_rows, num_chunks)."""
    gen = _tpu_generation()
    if gen == "v7":
        target_block_bytes = 4 << 20   # 16 MiB double-buffered total: fits the
        num_chunks = 2                 # 32 MiB scoped default, 64 MiB physical;
    elif gen == "v6":                  # one chunk per TensorCore.
        target_block_bytes = 4 << 20
        num_chunks = 1                 # single TC: avoid duplicate tail blocks
    else:                              # v5e / unknown: 16 MiB default scoped
        target_block_bytes = 2 << 20   # VMEM -> 8 MiB of pipeline buffers.
        num_chunks = 1
    tile_rows = max(
        _STRIP,
        (target_block_bytes // (_LANES * itemsize)) // _STRIP * _STRIP)
    return tile_rows, num_chunks


def rmse_loss(yhat: jax.Array, y: jax.Array, *, tile_rows: int | None = None,
              num_chunks: int | None = None) -> jax.Array:
    """sqrt(mean((yhat - y)**2)), matching torch.sqrt(nn.MSELoss()(yhat, y))."""
    assert yhat.shape == y.shape, "RMSELoss expects matching shapes"
    n = int(yhat.size)
    assert n > 0

    isz_a = yhat.dtype.itemsize
    isz_b = y.dtype.itemsize
    d_tile, d_chunks = _default_tiling(max(isz_a, isz_b))
    if tile_rows is None:
        tile_rows = d_tile
    if num_chunks is None:
        num_chunks = d_chunks
    assert tile_rows % _SUBLANES == 0 and tile_rows > 0
    assert num_chunks >= 1

    yhat_flat = yhat.reshape(-1)
    y_flat = y.reshape(-1)

    # Kernel consumes the multiple-of-1024 prefix (lane-dense (rows,128) slab,
    # metadata-only reshape when n % 1024 == 0); the <1024-element ragged tail
    # is folded into the scalar epilogue.  No jnp.pad copies of the inputs.
    n_main = (n // _GRAIN) * _GRAIN
    total = jnp.float32(0.0)

    if n_main < n:
        ta = jax.lax.slice(yhat_flat, (n_main,), (n,)).astype(jnp.float32)
        tb = jax.lax.slice(y_flat, (n_main,), (n,)).astype(jnp.float32)
        td = ta - tb
        total = total + jnp.sum(td * td)
        # TODO(synk): inputs with fewer than 1024 elements are handled entirely
        # by this plain-JAX tail path (no Pallas launch); tensors that small
        # are not worth a kernel.

    if n_main > 0:
        rows_main = n_main // _LANES                 # multiple of 8
        if n_main == n:
            yh2 = yhat_flat.reshape(rows_main, _LANES)
            y2 = y_flat.reshape(rows_main, _LANES)
        else:
            yh2 = jax.lax.slice(yhat_flat, (0,), (n_main,)).reshape(
                rows_main, _LANES)
            y2 = jax.lax.slice(y_flat, (0,), (n_main,)).reshape(
                rows_main, _LANES)

        tile = min(tile_rows, rows_main)             # multiple of 8
        nblocks = pl.cdiv(rows_main, tile)
        chunks = max(1, min(num_chunks, nblocks))
        steps = pl.cdiv(nblocks, chunks)
        needs_skip = (chunks * steps) != nblocks     # over-coverage duplicates
        has_partial_last = (rows_main % tile) != 0   # partial last block

        if needs_skip:
            # Clamp duplicate blocks onto the last real block (their compute
            # is skipped in-kernel), so the DMA never reads out of bounds.
            def in_map(i, j):
                return (jnp.minimum(i * steps + j, nblocks - 1), 0)
        else:
            def in_map(i, j):
                return (i * steps + j, 0)

        # 2 pipeline buffers per input, plus explicit headroom for compiler
        # scratch / intermediates.  <= 24 MiB -> safe on every generation.
        buf_bytes = 2 * tile * _LANES * (isz_a + isz_b)
        vmem_limit = max(16 << 20, buf_bytes + (8 << 20))

        cost = pl.CostEstimate(
            flops=3 * n_main,                        # sub, mul, add per element
            transcendentals=0,
            bytes_accessed=n_main * (isz_a + isz_b) + chunks * 4,
        )

        partials = pl.pallas_call(
            functools.partial(_rmse_partial_kernel, tile_rows=tile,
                              strip_rows=_STRIP, valid_rows=rows_main,
                              nblocks=nblocks, steps=steps,
                              needs_skip=needs_skip,
                              has_partial_last=has_partial_last),
            out_shape=jax.ShapeDtypeStruct((chunks, 1), jnp.float32),
            grid_spec=pltpu.PrefetchScalarGridSpec(
                num_scalar_prefetch=0,
                grid=(chunks, steps),
                in_specs=[
                    pl.BlockSpec((tile, _LANES), in_map),
                    pl.BlockSpec((tile, _LANES), in_map),
                ],
                out_specs=pl.BlockSpec((1, 1), lambda i, j: (i, 0),
                                       memory_space=pltpu.SMEM),
                scratch_shapes=[pltpu.VMEM((_SUBLANES, _LANES), jnp.float32)],
            ),
            compiler_params=pltpu.CompilerParams(
                # On v7x the parallel chunk axis lets both TensorCores stream
                # half the rows each; verify both engage in xprof, else switch
                # axis 0 to pltpu.CORE_PARALLEL.
                dimension_semantics=("parallel", "arbitrary"),
                vmem_limit_bytes=vmem_limit,
            ),
            cost_estimate=cost,
        )(yh2, y2)

        total = total + jnp.sum(partials)

    # f32 divide (jnp.float32(n) rounds for n > 2^24: negligible for a loss).
    return jnp.sqrt(total / jnp.float32(n))


if __name__ == "__main__":
    key = jax.random.PRNGKey(0)
    k1, k2 = jax.random.split(key)
    shape = (2, 4, 16, 16)  # small NCHW-style example input
    yhat = jax.random.normal(k1, shape, dtype=jnp.float32)
    y = jax.random.normal(k2, shape, dtype=jnp.float32)

    rmse = jax.jit(rmse_loss)
    result = jax.block_until_ready(rmse(yhat, y))

    # Reference (plain JAX) check of the semantics: sqrt(mean((yhat - y)^2))
    ref = jnp.sqrt(jnp.mean((yhat - y) ** 2))
    assert result.shape == ()
    assert jnp.allclose(result, ref, rtol=1e-5, atol=1e-6), (result, ref)

    print("KERNEL_OK")
</pallas_src>

<mosaic_0001>
module attributes {stable_mosaic.version = 11 : i64} {
  func.func @_rmse_partial_kernel(%arg0: i32, %arg1: i32, %arg2: memref<16x128xf32, #tpu.memory_space<vmem>>, %arg3: memref<16x128xf32, #tpu.memory_space<vmem>>, %arg4: memref<1x1xf32, #tpu.memory_space<smem>>, %arg5: memref<8x128xf32, #tpu.memory_space<vmem>>) attributes {dimension_semantics = [#tpu.dimension_semantics<parallel>, #tpu.dimension_semantics<arbitrary>], iteration_bounds = array<i64: 1, 1>, scalar_prefetch = 0 : i64, scratch_operands = 1 : i64, tpu.core_type = #tpu.core_type<tc>, window_params = [{transform_indices = @transform_0, window_bounds = array<i64: 16, 128>}, {transform_indices = @transform_1, window_bounds = array<i64: 16, 128>}, {transform_indices = @transform_2, window_bounds = array<i64: 1, 1>}]} {
    %c0_i32 = arith.constant 0 : i32
    %0 = arith.cmpi eq, %arg1, %c0_i32 : i32
    %1 = arith.extui %0 : i1 to i32
    %c0_i32_0 = arith.constant 0 : i32
    %2 = arith.cmpi ne, %1, %c0_i32_0 : i32
    scf.if %2 {
      %cst_10 = arith.constant 0.000000e+00 : f32
      %15 = vector.broadcast %cst_10 : f32 to vector<8x128xf32>
      %c0_11 = arith.constant 0 : index
      %c0_12 = arith.constant 0 : index
      %16 = vector.load %arg5[%c0_11, %c0_12] : memref<8x128xf32, #tpu.memory_space<vmem>>, vector<8x128xf32>
      tpu.vector_store %arg5[%c0_11, %c0_12], %15 {strides = array<i32>} : memref<8x128xf32, #tpu.memory_space<vmem>>, vector<8x128xf32>,
    } else {
    }
    %c0 = arith.constant 0 : index
    %c0_1 = arith.constant 0 : index
    %3 = vector.load %arg2[%c0, %c0_1] : memref<16x128xf32, #tpu.memory_space<vmem>>, vector<16x128xf32>
    %c0_2 = arith.constant 0 : index
    %c0_3 = arith.constant 0 : index
    %4 = vector.load %arg3[%c0_2, %c0_3] : memref<16x128xf32, #tpu.memory_space<vmem>>, vector<16x128xf32>
    %5 = arith.subf %3, %4 : vector<16x128xf32>
    %c0_4 = arith.constant 0 : index
    %c0_5 = arith.constant 0 : index
    %6 = vector.load %arg5[%c0_4, %c0_5] : memref<8x128xf32, #tpu.memory_space<vmem>>, vector<8x128xf32>
    %7 = arith.mulf %5, %5 : vector<16x128xf32>
    %8 = vector.shape_cast %7 : vector<16x128xf32> to vector<2x8x128xf32>
    %cst = arith.constant dense<0.000000e+00> : vector<8x128xf32>
    %9 = vector.multi_reduction <add>, %8, %cst [0] : vector<2x8x128xf32> to vector<8x128xf32>
    %10 = arith.addf %6, %9 : vector<8x128xf32>
    %c0_6 = arith.constant 0 : index
    %c0_7 = arith.constant 0 : index
    %11 = vector.load %arg5[%c0_6, %c0_7] : memref<8x128xf32, #tpu.memory_space<vmem>>, vector<8x128xf32>
    tpu.vector_store %arg5[%c0_6, %c0_7], %10 {strides = array<i32>} : memref<8x128xf32, #tpu.memory_space<vmem>>, vector<8x128xf32>,
    %c0_i32_8 = arith.constant 0 : i32
    %12 = arith.cmpi eq, %arg1, %c0_i32_8 : i32
    %13 = arith.extui %12 : i1 to i32
    %c0_i32_9 = arith.constant 0 : i32
    %14 = arith.cmpi ne, %13, %c0_i32_9 : i32
    scf.if %14 {
      %c0_10 = arith.constant 0 : index
      %c0_11 = arith.constant 0 : index
      %15 = vector.load %arg5[%c0_10, %c0_11] : memref<8x128xf32, #tpu.memory_space<vmem>>, vector<8x128xf32>
      %16 = vector.shape_cast %15 : vector<8x128xf32> to vector<1x8x128xf32>
      %cst_12 = arith.constant dense<0.000000e+00> : vector<1xf32>
      %17 = vector.multi_reduction <add>, %16, %cst_12 [1, 2] : vector<1x8x128xf32> to vector<1xf32>
      %18 = vector.shape_cast %17 : vector<1xf32> to vector<1x1x1xf32>
      %19 = vector.extract %18[0, 0, 0] : f32 from vector<1x1x1xf32>
      %c0_13 = arith.constant 0 : index
      %c0_14 = arith.constant 0 : index
      %20 = memref.load %arg4[%c0_13, %c0_14] : memref<1x1xf32, #tpu.memory_space<smem>>
      memref.store %19, %arg4[%c0_13, %c0_14] : memref<1x1xf32, #tpu.memory_space<smem>>
    } else {
    }
    return
  }
  func.func @transform_0(%arg0: i32, %arg1: i32) -> (i32, i32) {
    %c1_i32 = arith.constant 1 : i32
    %0 = arith.muli %arg0, %c1_i32 : i32
    %1 = arith.addi %0, %arg1 : i32
    %c0_i32 = arith.constant 0 : i32
    %c0_i32_0 = arith.constant 0 : i32
    return %1, %c0_i32 : i32, i32
  }
  func.func @transform_1(%arg0: i32, %arg1: i32) -> (i32, i32) {
    %c1_i32 = arith.constant 1 : i32
    %0 = arith.muli %arg0, %c1_i32 : i32
    %1 = arith.addi %0, %arg1 : i32
    %c0_i32 = arith.constant 0 : i32
    %c0_i32_0 = arith.constant 0 : i32
    return %1, %c0_i32 : i32, i32
  }
  func.func @transform_2(%arg0: i32, %arg1: i32) -> (i32, i32) {
    %c0_i32 = arith.constant 0 : i32
    %c0_i32_0 = arith.constant 0 : i32
    return %arg0, %c0_i32 : i32, i32
  }
}

</mosaic_0001>

<bundles_post_ra>
// kernel: rmse_loss.1
= control target key start
LH: loop header
LB: loop body
LE: loop exit
PB: predicated region body
PF: predicated region fallthrough
CT: control target
= control target key end

     0   :  { %s157_s0 = inlined_call_operand.vmem [shape: f32[16,128], index: 0, kind: input, shape index: {}]   ;;  %s158_s1 = inlined_call_operand.vmem [shape: f32[16,128], index: 1, kind: input, shape index: {}]   ;;  %s159_s2 = inlined_call_operand.hbm [shape: f32[1,1], index: 2, kind: output, shape index: {}]  }
   0x1   :  { %v61_v0 = vld [vmem:[%s157_s0] sm:$0xff]  ;;  %v62_v1 = vld [vmem:[%s157_s0 + $0x8] sm:$0xff] }
   0x2   :  { %v63_v2 = vld [vmem:[%s158_s1] sm:$0xff]  ;;  %v64_v3 = vld [vmem:[%s158_s1 + $0x8] sm:$0xff] }
   0x3   :  { %v65_v4 = vsub.f32 %v61_v0, %v63_v2 }
   0x4   :  { %7 = vsyncpa [#allocation4], 0  ;;  %v66_v5 = vsub.f32 %v62_v1, %v64_v3  ;;  %s126_s17 = smov [#allocation3]  }
   0x5   :  { %v68_v6 = vmul.f32 %v65_v4, %v65_v4 }
   0x6   :  { %v69_v7 = vmul.f32 %v66_v5, %v66_v5 }
   0x8   :  { %v70_v8 = vadd.f32 %v69_v7, %v68_v6 }
   0xa   :  { %77 = vadd.xlane.f32.xlu0 %v70_v8 }
  0x93   :  { %v78_v9 = vpop.xlane.xlu0 %77 }
  0x94   :  { %v79_v10 = vrot.slane %v78_v9, 4 }
  0x96   :  { %v80_v11 = vadd.f32 %v79_v10, %v78_v9 }
  0x98   :  { %v81_v12 = vrot.slane %v80_v11, 2 }
  0x9a   :  { %v82_v13 = vadd.f32 %v81_v12, %v80_v11 }
  0x9c   :  { %v83_v14 = vrot.slane %v82_v13, 1 }
  0x9e   :  { %v84_v15 = vadd.f32 %v83_v14, %v82_v13 }
  0xa0   :  { %113 = vpush %v84_v15 }
  0xd1   :  { %s114_s0 = spop %113 }
  0xd2   :  { %87 = sst [smem:[#allocation3]] %s114_s0 }
  0xd3   :  { %95 = dma.smem_to_hbm %s126_s17, 16, %s159_s2, [#allocation4]  }
  0xd4   :  { %124 = dma.done.wait [#allocation4], 16  }
  0xd5   :  { %125 = vsyncadd [#allocation4], 4294967280 }
  0xd6   :  { %99 = sfence }
  0xd7   :  { %100 = vsyncpa [#allocation4], 1 }

</bundles_post_ra>
